<compile_context>
chip_gen: v5e
topology: v5e:2x2
jax: 0.10.0
libtpu: 0.0.40
codegen_flags: <defaults>
</compile_context>

<pallas_src>
import functools

import jax
import jax.numpy as jnp
from jax import lax
from jax.experimental import pallas as pl
from jax.experimental.pallas import tpu as pltpu

NODE_DIM = 6
EDGE_DIM = 3
HIDDEN = 64
MSG_IN = 2 * NODE_DIM + EDGE_DIM          # 15
MSG_IN_PAD = 16                           # 15 features + 1 ones column (bias folded)
OUT_DIM = 3
OUT_PAD = 128                             # lane-dense output slab width

# bf16 message-weight slab layout (16-row-aligned sections), width HIDDEN.
MSG_SLAB_ROWS = 256
_W1, _W2, _W3, _W4 = 0, 16, 80, 144
_B2, _B3, _B4 = 208, 224, 240

# f32 update-weight slab layout (8-row-aligned sections), width OUT_PAD.
UPD_SLAB_ROWS = 224
_U1A, _U1B, _U2, _U3 = 0, 8, 72, 136
_UB1, _UB2, _UB3 = 200, 208, 216


def _round_up(v, m):
    return ((v + m - 1) // m) * m


def _supports_bf16_act():
    """bf16 VPU/EUP activations only on v6e / v7x; f32 path elsewhere."""
    try:
        kind = jax.devices()[0].device_kind.lower()
    except Exception:
        return False
    return any(tag in kind for tag in ("v6", "v7", "7x"))


def particle_gnn_kernel(flags_ref, feat_ref, tgt_ref, x_ref, wm_ref, wu_ref,
                        out_ref, acc_ref, *, bf16_act):
    f32 = jnp.float32
    bf16 = jnp.bfloat16
    i = pl.program_id(0)                       # node tile ("parallel")
    k = pl.program_id(1)                       # edge tile ("arbitrary" reduction)
    n_k = pl.num_programs(1)
    n_tile = acc_ref.shape[0]
    e_tile = feat_ref.shape[0]

    @pl.when(k == 0)
    def _init():
        acc_ref[...] = jnp.zeros_like(acc_ref)

    # Skip the message MLP + scatter entirely when this edge tile has no edge
    # targeting this node tile (edges are sorted by target in the wrapper, so
    # most (i, k) pairs are inactive).
    @pl.when(flags_ref[i * n_k + k] > 0)
    def _message_and_scatter():
        w1 = wm_ref[_W1:_W1 + MSG_IN_PAD, :]   # bias b1 folded into row 15
        w2 = wm_ref[_W2:_W2 + HIDDEN, :]
        w3 = wm_ref[_W3:_W3 + HIDDEN, :]
        w4 = wm_ref[_W4:_W4 + HIDDEN, :]
        b2 = wm_ref[_B2:_B2 + 1, :]
        b3 = wm_ref[_B3:_B3 + 1, :]
        b4 = wm_ref[_B4:_B4 + 1, :]

        if bf16_act:
            # bf16 activations (v6e/v7x): MXU still accumulates in f32.
            h = jnp.tanh(jnp.dot(feat_ref[...], w1, preferred_element_type=bf16))
            h = jnp.tanh(jnp.dot(h, w2, preferred_element_type=bf16) + b2)
            h = jnp.tanh(jnp.dot(h, w3, preferred_element_type=bf16) + b3)
            msg = jnp.dot(h, w4, preferred_element_type=bf16) + b4
        else:
            # f32 activation path (v5e-safe: no bf16 VALU/EUP).
            h = jnp.tanh(jnp.dot(feat_ref[...], w1, preferred_element_type=f32))
            h = jnp.tanh(jnp.dot(h.astype(bf16), w2, preferred_element_type=f32)
                         + b2.astype(f32))
            h = jnp.tanh(jnp.dot(h.astype(bf16), w3, preferred_element_type=f32)
                         + b3.astype(f32))
            msg = (jnp.dot(h.astype(bf16), w4, preferred_element_type=f32)
                   + b4.astype(f32)).astype(bf16)

        # aggr='add': one-hot scatter tile fed to the MXU.  The iota is
        # k-invariant; only the [1, e_tile] target row is shifted per node tile.
        local_ids = lax.broadcasted_iota(jnp.int32, (n_tile, e_tile), 0)
        tgt_local = tgt_ref[...] - i * n_tile          # padded edges stay negative
        scat = (local_ids == tgt_local).astype(bf16)   # [n_tile, e_tile]
        acc_ref[...] += jnp.dot(scat, msg, preferred_element_type=f32)

    # Update MLP + lane-dense store once all edge tiles for this node tile are done.
    @pl.when(k == n_k - 1)
    def _finalize():
        u1a = wu_ref[_U1A:_U1A + NODE_DIM, :HIDDEN]
        u1b = wu_ref[_U1B:_U1B + HIDDEN, :HIDDEN]
        u2 = wu_ref[_U2:_U2 + HIDDEN, :HIDDEN]
        u3 = wu_ref[_U3:_U3 + HIDDEN, :]
        ub1 = wu_ref[_UB1:_UB1 + 1, :HIDDEN]
        ub2 = wu_ref[_UB2:_UB2 + 1, :HIDDEN]
        ub3 = wu_ref[_UB3:_UB3 + 1, :]
        u = jnp.tanh(jnp.dot(x_ref[...], u1a, preferred_element_type=f32)
                     + jnp.dot(acc_ref[...], u1b, preferred_element_type=f32)
                     + ub1)
        u = jnp.tanh(jnp.dot(u, u2, preferred_element_type=f32) + ub2)
        out_ref[...] = jnp.dot(u, u3, preferred_element_type=f32) + ub3


def init_params(key):
    """Deterministic init matching the PyTorch Linear shapes (weights stored
    transposed, i.e. (in_features, out_features))."""
    def linear(k, fan_in, fan_out):
        k1, k2 = jax.random.split(k)
        bound = 1.0 / jnp.sqrt(fan_in)
        w = jax.random.uniform(k1, (fan_in, fan_out), jnp.float32, -bound, bound)
        b = jax.random.uniform(k2, (1, fan_out), jnp.float32, -bound, bound)
        return w, b

    keys = jax.random.split(key, 7)
    # message MLP: Linear(15->64) Tanh Linear(64->64) Tanh Linear(64->64) Tanh Linear(64->64)
    w1, b1 = linear(keys[0], MSG_IN, HIDDEN)
    w2, b2 = linear(keys[1], HIDDEN, HIDDEN)
    w3, b3 = linear(keys[2], HIDDEN, HIDDEN)
    w4, b4 = linear(keys[3], HIDDEN, HIDDEN)
    # update MLP: Linear(70->64) Tanh Linear(64->64) Tanh Linear(64->3)
    u1, ub1 = linear(keys[4], NODE_DIM + HIDDEN, HIDDEN)
    u2, ub2 = linear(keys[5], HIDDEN, HIDDEN)
    u3, ub3 = linear(keys[6], HIDDEN, OUT_DIM)
    return dict(w1=w1, b1=b1, w2=w2, b2=b2, w3=w3, b3=b3, w4=w4, b4=b4,
                u1=u1, ub1=ub1, u2=u2, ub2=ub2, u3=u3, ub3=ub3)


def pack_msg_slab(p):
    """Message-MLP weights + biases packed into one bf16 slab (b1 folded into w1)."""
    slab = jnp.zeros((MSG_SLAB_ROWS, HIDDEN), jnp.float32)
    w1f = jnp.concatenate([p["w1"], p["b1"]], axis=0)       # [16, 64]
    slab = slab.at[_W1:_W1 + MSG_IN_PAD].set(w1f)
    slab = slab.at[_W2:_W2 + HIDDEN].set(p["w2"])
    slab = slab.at[_W3:_W3 + HIDDEN].set(p["w3"])
    slab = slab.at[_W4:_W4 + HIDDEN].set(p["w4"])
    slab = slab.at[_B2].set(p["b2"][0])
    slab = slab.at[_B3].set(p["b3"][0])
    slab = slab.at[_B4].set(p["b4"][0])
    return slab.astype(jnp.bfloat16)


def pack_upd_slab(p):
    """Update-MLP weights + biases packed into one f32 slab of width OUT_PAD."""
    slab = jnp.zeros((UPD_SLAB_ROWS, OUT_PAD), jnp.float32)
    slab = slab.at[_U1A:_U1A + NODE_DIM, :HIDDEN].set(p["u1"][:NODE_DIM])
    slab = slab.at[_U1B:_U1B + HIDDEN, :HIDDEN].set(p["u1"][NODE_DIM:])
    slab = slab.at[_U2:_U2 + HIDDEN, :HIDDEN].set(p["u2"])
    slab = slab.at[_U3:_U3 + HIDDEN, :OUT_DIM].set(p["u3"])
    slab = slab.at[_UB1, :HIDDEN].set(p["ub1"][0])
    slab = slab.at[_UB2, :HIDDEN].set(p["ub2"][0])
    slab = slab.at[_UB3, :OUT_DIM].set(p["ub3"][0])
    return slab


def _vmem_limit_bytes(n_tile, e_tile):
    """Scoped-VMEM budget computed from actual buffers (instead of a blanket 32 MiB)."""
    def buf(rows, cols, itemsize, sub=8):
        return _round_up(rows, sub) * _round_up(cols, 128) * itemsize
    est = (2 * buf(e_tile, MSG_IN_PAD, 2, 16)       # feat, double-buffered bf16
           + 2 * buf(1, e_tile, 4)                  # tgt
           + 2 * buf(n_tile, NODE_DIM, 4)           # x
           + 2 * buf(MSG_SLAB_ROWS, HIDDEN, 2, 16)  # message-weight slab
           + 2 * buf(UPD_SLAB_ROWS, OUT_PAD, 4)     # update-weight slab
           + 2 * buf(n_tile, OUT_PAD, 4)            # output slab
           + buf(n_tile, HIDDEN, 4)                 # accumulator scratch
           + 4 * buf(e_tile, HIDDEN, 4)             # h / msg intermediates
           + buf(n_tile, e_tile, 2))                # one-hot scatter tile
    # + headroom for compiler temporaries, clamped inside v7x's 64 MiB physical VMEM.
    return int(min(max(est + (8 << 20), 16 << 20), 64 << 20))


def particle_net_forward(x, edge_index, edge_attr, params, *,
                         edge_tile=2048, node_tile=256, bf16_act=None):
    """ParticleNet.forward(data) -> delta_x of shape [N, 3]."""
    if bf16_act is None:
        bf16_act = _supports_bf16_act()
    f32, bf16 = jnp.float32, jnp.bfloat16

    n = x.shape[0]
    e = edge_attr.shape[0]
    src = edge_index[0].astype(jnp.int32)     # x_j (source), PyG flow source_to_target
    tgt = edge_index[1].astype(jnp.int32)     # x_i (target) and aggregation index

    # Sort edges by target so every edge tile overlaps only 1-2 node tiles.
    order = jnp.argsort(tgt)
    src, tgt, edge_attr = src[order], tgt[order], edge_attr[order]

    # Tile sizes respecting the (8, 128) layout rules; shrink for tiny graphs.
    e_tile = min(edge_tile, _round_up(e, 128))
    e_pad = _round_up(e, e_tile)
    n_tile = min(node_tile, _round_up(n, 8))
    n_pad = _round_up(n, n_tile)
    if n_pad // n_tile < 2 and n > 8:
        # v7x has 2 TensorCores: give the "parallel" node axis >= 2 slices.
        n_tile = _round_up((n + 1) // 2, 8)
        n_pad = _round_up(n, n_tile)
    n_tiles = n_pad // n_tile
    e_tiles = e_pad // e_tile

    # Fused first-layer input [x_i | x_j | edge_attr | 1] (b1 folded), bf16.
    ones = jnp.ones((e, 1), f32)
    feat = jnp.concatenate([x[tgt], x[src], edge_attr, ones], axis=-1)
    feat = jnp.pad(feat, ((0, e_pad - e), (0, 0))).astype(bf16)

    # Scatter targets; padded edges get -1 so they match no node row.
    tgt_pad = jnp.pad(tgt, (0, e_pad - e), constant_values=-1).reshape(1, e_pad)

    x_pad = jnp.pad(x.astype(f32), ((0, n_pad - n), (0, 0)))

    # Per-(node_tile, edge_tile) overlap flags (scalar-prefetched into SMEM).
    blk = tgt // n_tile
    min_blk = jnp.min(jnp.pad(blk, (0, e_pad - e), constant_values=n_tiles)
                      .reshape(e_tiles, e_tile), axis=1)
    max_blk = jnp.max(jnp.pad(blk, (0, e_pad - e), constant_values=-1)
                      .reshape(e_tiles, e_tile), axis=1)
    ii = jnp.arange(n_tiles, dtype=jnp.int32)[:, None]
    flags = ((min_blk[None, :] <= ii) & (ii <= max_blk[None, :]))
    flags = flags.astype(jnp.int32).reshape(-1)            # [n_tiles * e_tiles]

    wm = pack_msg_slab(params)          # [256, 64]  bf16
    wu = pack_upd_slab(params)          # [224, 128] f32

    kernel = functools.partial(particle_gnn_kernel, bf16_act=bool(bf16_act))

    _E = e_tiles                        # captured Python int for the index maps
    in_specs = [
        # feat / tgt collapse to block 0 when this (i, k) pair is inactive so
        # the pipeline does not re-fetch every edge tile for every node tile.
        pl.BlockSpec((e_tile, MSG_IN_PAD),
                     lambda i, k, f: (f[i * _E + k] * k, 0)),
        pl.BlockSpec((1, e_tile),
                     lambda i, k, f: (0, f[i * _E + k] * k)),
        pl.BlockSpec((n_tile, NODE_DIM), lambda i, k, f: (i, 0)),
        pl.BlockSpec((MSG_SLAB_ROWS, HIDDEN), lambda i, k, f: (0, 0)),
        pl.BlockSpec((UPD_SLAB_ROWS, OUT_PAD), lambda i, k, f: (0, 0)),
    ]
    out_spec = pl.BlockSpec((n_tile, OUT_PAD), lambda i, k, f: (i, 0))

    out = pl.pallas_call(
        kernel,
        out_shape=jax.ShapeDtypeStruct((n_pad, OUT_PAD), f32),
        grid_spec=pltpu.PrefetchScalarGridSpec(
            num_scalar_prefetch=1,
            grid=(n_tiles, e_tiles),
            in_specs=in_specs,
            out_specs=out_spec,
            scratch_shapes=[pltpu.VMEM((n_tile, HIDDEN), f32)],
        ),
        compiler_params=pltpu.CompilerParams(
            dimension_semantics=("parallel", "arbitrary"),
            vmem_limit_bytes=_vmem_limit_bytes(n_tile, e_tile),
        ),
    )(flags, feat, tgt_pad, x_pad, wm, wu)
    return out[:n, :OUT_DIM]


def particle_net_reference(x, edge_index, edge_attr, params, *, bf16_act=False):
    """Pure-JAX reference mirroring the kernel's mixed precision."""
    p = params
    bf16, f32 = jnp.bfloat16, jnp.float32
    hi = lax.Precision.HIGHEST
    src, tgt = edge_index[0], edge_index[1]
    e = edge_attr.shape[0]

    ones = jnp.ones((e, 1), f32)
    feat = jnp.concatenate([x[tgt], x[src], edge_attr, ones], axis=-1).astype(bf16)
    w1f = jnp.concatenate([p["w1"], p["b1"]], axis=0).astype(bf16)
    w2, w3, w4 = p["w2"].astype(bf16), p["w3"].astype(bf16), p["w4"].astype(bf16)
    if bf16_act:
        b2, b3, b4 = (p["b2"].astype(bf16), p["b3"].astype(bf16), p["b4"].astype(bf16))
        h = jnp.tanh(jnp.dot(feat, w1f, preferred_element_type=bf16))
        h = jnp.tanh(jnp.dot(h, w2, preferred_element_type=bf16) + b2)
        h = jnp.tanh(jnp.dot(h, w3, preferred_element_type=bf16) + b3)
        msg = jnp.dot(h, w4, preferred_element_type=bf16) + b4
    else:
        # Kernel stores the biases in the bf16 slab -> round them the same way.
        b2r = p["b2"].astype(bf16).astype(f32)
        b3r = p["b3"].astype(bf16).astype(f32)
        b4r = p["b4"].astype(bf16).astype(f32)
        h = jnp.tanh(jnp.dot(feat, w1f, preferred_element_type=f32))
        h = jnp.tanh(jnp.dot(h.astype(bf16), w2, preferred_element_type=f32) + b2r)
        h = jnp.tanh(jnp.dot(h.astype(bf16), w3, preferred_element_type=f32) + b3r)
        msg = (jnp.dot(h.astype(bf16), w4, preferred_element_type=f32) + b4r).astype(bf16)

    aggr = jax.ops.segment_sum(msg.astype(f32), tgt, num_segments=x.shape[0])

    u1a, u1b = p["u1"][:NODE_DIM], p["u1"][NODE_DIM:]
    u = jnp.tanh(jnp.dot(x, u1a, precision=hi)
                 + jnp.dot(aggr, u1b, precision=hi) + p["ub1"])
    u = jnp.tanh(jnp.dot(u, p["u2"], precision=hi) + p["ub2"])
    return jnp.dot(u, p["u3"], precision=hi) + p["ub3"]


if __name__ == "__main__":
    key = jax.random.PRNGKey(0)
    k_param, k_x, k_src, k_tgt, k_ea = jax.random.split(key, 5)

    N_NODES = 16   # number of particles
    N_EDGES = 48   # number of interactions

    params = init_params(k_param)
    x = jax.random.normal(k_x, (N_NODES, NODE_DIM), jnp.float32)
    edge_index = jnp.stack(
        [
            jax.random.randint(k_src, (N_EDGES,), 0, N_NODES, jnp.int32),
            jax.random.randint(k_tgt, (N_EDGES,), 0, N_NODES, jnp.int32),
        ],
        axis=0,
    )
    edge_attr = jax.random.normal(k_ea, (N_EDGES, EDGE_DIM), jnp.float32)

    bf16_act = _supports_bf16_act()
    delta_x = particle_net_forward(x, edge_index, edge_attr, params,
                                   bf16_act=bf16_act)
    delta_x = jax.block_until_ready(delta_x)
    assert delta_x.shape == (N_NODES, OUT_DIM)

    ref = particle_net_reference(x, edge_index, edge_attr, params,
                                 bf16_act=bf16_act)
    max_err = float(jnp.max(jnp.abs(delta_x - ref)))
    assert jnp.allclose(delta_x, ref, atol=2e-2, rtol=2e-2), (
        f"mismatch vs reference (max abs err {max_err})")

    print("KERNEL_OK")
</pallas_src>

<mosaic_0001>
module attributes {stable_mosaic.version = 11 : i64} {
  func.func @particle_gnn_kernel(%arg0: i32, %arg1: i32, %arg2: memref<2xi32, #tpu.memory_space<smem>>, %arg3: memref<128x16xbf16, #tpu.memory_space<vmem>>, %arg4: memref<1x128xi32, #tpu.memory_space<vmem>>, %arg5: memref<8x6xf32, #tpu.memory_space<vmem>>, %arg6: memref<256x64xbf16, #tpu.memory_space<vmem>>, %arg7: memref<224x128xf32, #tpu.memory_space<vmem>>, %arg8: memref<8x128xf32, #tpu.memory_space<vmem>>, %arg9: memref<8x64xf32, #tpu.memory_space<vmem>>) attributes {dimension_semantics = [#tpu.dimension_semantics<parallel>, #tpu.dimension_semantics<arbitrary>], iteration_bounds = array<i64: 2, 1>, scalar_prefetch = 1 : i64, scratch_operands = 1 : i64, tpu.core_type = #tpu.core_type<tc>, window_params = [{transform_indices = @transform_0, window_bounds = array<i64: 128, 16>}, {transform_indices = @transform_1, window_bounds = array<i64: 1, 128>}, {transform_indices = @transform_2, window_bounds = array<i64: 8, 6>}, {pipeline_mode = #tpu.pipeline_mode<synchronous>, transform_indices = @transform_3, window_bounds = array<i64: 256, 64>}, {pipeline_mode = #tpu.pipeline_mode<synchronous>, transform_indices = @transform_4, window_bounds = array<i64: 224, 128>}, {transform_indices = @transform_5, window_bounds = array<i64: 8, 128>}]} {
    %c0_i32 = arith.constant 0 : i32
    %0 = arith.cmpi eq, %arg1, %c0_i32 : i32
    %1 = arith.extui %0 : i1 to i32
    %c0_i32_0 = arith.constant 0 : i32
    %2 = arith.cmpi ne, %1, %c0_i32_0 : i32
    scf.if %2 {
      %cst = arith.constant 0.000000e+00 : f32
      %13 = vector.broadcast %cst : f32 to vector<8x64xf32>
      %c0 = arith.constant 0 : index
      %c0_5 = arith.constant 0 : index
      %14 = vector.load %arg9[%c0, %c0_5] : memref<8x64xf32, #tpu.memory_space<vmem>>, vector<8x64xf32>
      tpu.vector_store %arg9[%c0, %c0_5], %13 {strides = array<i32>} : memref<8x64xf32, #tpu.memory_space<vmem>>, vector<8x64xf32>,
    } else {
    }
    %c1_i32 = arith.constant 1 : i32
    %3 = arith.muli %arg0, %c1_i32 : i32
    %4 = arith.addi %3, %arg1 : i32
    %5 = arith.index_cast %4 : i32 to index
    %6 = memref.load %arg2[%5] : memref<2xi32, #tpu.memory_space<smem>>
    %c0_i32_1 = arith.constant 0 : i32
    %7 = arith.cmpi sgt, %6, %c0_i32_1 : i32
    %8 = arith.extui %7 : i1 to i32
    %c0_i32_2 = arith.constant 0 : i32
    %9 = arith.cmpi ne, %8, %c0_i32_2 : i32
    scf.if %9 {
      %c0 = arith.constant 0 : index
      %c0_5 = arith.constant 0 : index
      %13 = vector.load %arg6[%c0, %c0_5] : memref<256x64xbf16, #tpu.memory_space<vmem>>, vector<16x64xbf16>
      %c16 = arith.constant 16 : index
      %c0_6 = arith.constant 0 : index
      %14 = vector.load %arg6[%c16, %c0_6] : memref<256x64xbf16, #tpu.memory_space<vmem>>, vector<64x64xbf16>
      %c80 = arith.constant 80 : index
      %c0_7 = arith.constant 0 : index
      %15 = vector.load %arg6[%c80, %c0_7] : memref<256x64xbf16, #tpu.memory_space<vmem>>, vector<64x64xbf16>
      %c144 = arith.constant 144 : index
      %c0_8 = arith.constant 0 : index
      %16 = vector.load %arg6[%c144, %c0_8] : memref<256x64xbf16, #tpu.memory_space<vmem>>, vector<64x64xbf16>
      %c208 = arith.constant 208 : index
      %c0_9 = arith.constant 0 : index
      %17 = vector.load %arg6[%c208, %c0_9] : memref<256x64xbf16, #tpu.memory_space<vmem>>, vector<1x64xbf16>
      %c224 = arith.constant 224 : index
      %c0_10 = arith.constant 0 : index
      %18 = vector.load %arg6[%c224, %c0_10] : memref<256x64xbf16, #tpu.memory_space<vmem>>, vector<1x64xbf16>
      %c240 = arith.constant 240 : index
      %c0_11 = arith.constant 0 : index
      %19 = vector.load %arg6[%c240, %c0_11] : memref<256x64xbf16, #tpu.memory_space<vmem>>, vector<1x64xbf16>
      %c0_12 = arith.constant 0 : index
      %c0_13 = arith.constant 0 : index
      %20 = vector.load %arg3[%c0_12, %c0_13] : memref<128x16xbf16, #tpu.memory_space<vmem>>, vector<128x16xbf16>
      %cst = arith.constant dense<0.000000e+00> : vector<128x64xf32>
      %21 = tpu.matmul %20, %13, %cst {dimension_numbers = #tpu.dot_dimension_numbers<[1], [0], [0], [1], [0, 0, 1, 1], [], []>} : vector<128x16xbf16>, vector<16x64xbf16>, vector<128x64xf32> -> vector<128x64xf32>
      %22 = math.tanh %21 : vector<128x64xf32>
      %23 = arith.truncf %22 : vector<128x64xf32> to vector<128x64xbf16>
      %cst_14 = arith.constant dense<0.000000e+00> : vector<128x64xf32>
      %24 = tpu.matmul %23, %14, %cst_14 {dimension_numbers = #tpu.dot_dimension_numbers<[1], [0], [0], [1], [0, 0, 1, 1], [], []>} : vector<128x64xbf16>, vector<64x64xbf16>, vector<128x64xf32> -> vector<128x64xf32>
      %25 = arith.extf %17 : vector<1x64xbf16> to vector<1x64xf32>
      %26 = vector.broadcast %25 : vector<1x64xf32> to vector<128x64xf32>
      %27 = arith.addf %24, %26 : vector<128x64xf32>
      %28 = math.tanh %27 : vector<128x64xf32>
      %29 = arith.truncf %28 : vector<128x64xf32> to vector<128x64xbf16>
      %cst_15 = arith.constant dense<0.000000e+00> : vector<128x64xf32>
      %30 = tpu.matmul %29, %15, %cst_15 {dimension_numbers = #tpu.dot_dimension_numbers<[1], [0], [0], [1], [0, 0, 1, 1], [], []>} : vector<128x64xbf16>, vector<64x64xbf16>, vector<128x64xf32> -> vector<128x64xf32>
      %31 = arith.extf %18 : vector<1x64xbf16> to vector<1x64xf32>
      %32 = vector.broadcast %31 : vector<1x64xf32> to vector<128x64xf32>
      %33 = arith.addf %30, %32 : vector<128x64xf32>
      %34 = math.tanh %33 : vector<128x64xf32>
      %35 = arith.truncf %34 : vector<128x64xf32> to vector<128x64xbf16>
      %cst_16 = arith.constant dense<0.000000e+00> : vector<128x64xf32>
      %36 = tpu.matmul %35, %16, %cst_16 {dimension_numbers = #tpu.dot_dimension_numbers<[1], [0], [0], [1], [0, 0, 1, 1], [], []>} : vector<128x64xbf16>, vector<64x64xbf16>, vector<128x64xf32> -> vector<128x64xf32>
      %37 = arith.extf %19 : vector<1x64xbf16> to vector<1x64xf32>
      %38 = vector.broadcast %37 : vector<1x64xf32> to vector<128x64xf32>
      %39 = arith.addf %36, %38 : vector<128x64xf32>
      %40 = arith.truncf %39 : vector<128x64xf32> to vector<128x64xbf16>
      %41 = tpu.iota {dimensions = array<i32: 0>} : vector<8x128xi32>
      %c0_17 = arith.constant 0 : index
      %c0_18 = arith.constant 0 : index
      %42 = vector.load %arg4[%c0_17, %c0_18] : memref<1x128xi32, #tpu.memory_space<vmem>>, vector<1x128xi32>
      %c8_i32 = arith.constant 8 : i32
      %43 = arith.muli %arg0, %c8_i32 : i32
      %44 = vector.broadcast %43 : i32 to vector<1x128xi32>
      %45 = arith.subi %42, %44 : vector<1x128xi32>
      %46 = vector.broadcast %45 : vector<1x128xi32> to vector<8x128xi32>
      %47 = arith.cmpi eq, %41, %46 : vector<8x128xi32>
      %48 = arith.extui %47 : vector<8x128xi1> to vector<8x128xi32>
      %49 = arith.sitofp %48 : vector<8x128xi32> to vector<8x128xf32>
      %50 = arith.truncf %49 : vector<8x128xf32> to vector<8x128xbf16>
      %c0_19 = arith.constant 0 : index
      %c0_20 = arith.constant 0 : index
      %51 = vector.load %arg9[%c0_19, %c0_20] : memref<8x64xf32, #tpu.memory_space<vmem>>, vector<8x64xf32>
      %cst_21 = arith.constant dense<0.000000e+00> : vector<8x64xf32>
      %52 = tpu.matmul %50, %40, %cst_21 {dimension_numbers = #tpu.dot_dimension_numbers<[1], [0], [0], [1], [0, 0, 1, 1], [], []>} : vector<8x128xbf16>, vector<128x64xbf16>, vector<8x64xf32> -> vector<8x64xf32>
      %53 = arith.addf %51, %52 : vector<8x64xf32>
      %c0_22 = arith.constant 0 : index
      %c0_23 = arith.constant 0 : index
      %54 = vector.load %arg9[%c0_22, %c0_23] : memref<8x64xf32, #tpu.memory_space<vmem>>, vector<8x64xf32>
      tpu.vector_store %arg9[%c0_22, %c0_23], %53 {strides = array<i32>} : memref<8x64xf32, #tpu.memory_space<vmem>>, vector<8x64xf32>,
    } else {
    }
    %c0_i32_3 = arith.constant 0 : i32
    %10 = arith.cmpi eq, %arg1, %c0_i32_3 : i32
    %11 = arith.extui %10 : i1 to i32
    %c0_i32_4 = arith.constant 0 : i32
    %12 = arith.cmpi ne, %11, %c0_i32_4 : i32
    scf.if %12 {
      %c0 = arith.constant 0 : index
      %c0_5 = arith.constant 0 : index
      %13 = vector.load %arg7[%c0, %c0_5] : memref<224x128xf32, #tpu.memory_space<vmem>>, vector<6x64xf32>
      %c8 = arith.constant 8 : index
      %c0_6 = arith.constant 0 : index
      %14 = vector.load %arg7[%c8, %c0_6] : memref<224x128xf32, #tpu.memory_space<vmem>>, vector<64x64xf32>
      %c72 = arith.constant 72 : index
      %c0_7 = arith.constant 0 : index
      %15 = vector.load %arg7[%c72, %c0_7] : memref<224x128xf32, #tpu.memory_space<vmem>>, vector<64x64xf32>
      %c136 = arith.constant 136 : index
      %c0_8 = arith.constant 0 : index
      %16 = vector.load %arg7[%c136, %c0_8] : memref<224x128xf32, #tpu.memory_space<vmem>>, vector<64x128xf32>
      %c200 = arith.constant 200 : index
      %c0_9 = arith.constant 0 : index
      %17 = vector.load %arg7[%c200, %c0_9] : memref<224x128xf32, #tpu.memory_space<vmem>>, vector<1x64xf32>
      %c208 = arith.constant 208 : index
      %c0_10 = arith.constant 0 : index
      %18 = vector.load %arg7[%c208, %c0_10] : memref<224x128xf32, #tpu.memory_space<vmem>>, vector<1x64xf32>
      %c216 = arith.constant 216 : index
      %c0_11 = arith.constant 0 : index
      %19 = vector.load %arg7[%c216, %c0_11] : memref<224x128xf32, #tpu.memory_space<vmem>>, vector<1x128xf32>
      %c0_12 = arith.constant 0 : index
      %c0_13 = arith.constant 0 : index
      %20 = vector.load %arg5[%c0_12, %c0_13] : memref<8x6xf32, #tpu.memory_space<vmem>>, vector<8x6xf32>
      %cst = arith.constant dense<0.000000e+00> : vector<8x64xf32>
      %21 = tpu.matmul %20, %13, %cst {dimension_numbers = #tpu.dot_dimension_numbers<[1], [0], [0], [1], [0, 0, 1, 1], [], []>} : vector<8x6xf32>, vector<6x64xf32>, vector<8x64xf32> -> vector<8x64xf32>
      %c0_14 = arith.constant 0 : index
      %c0_15 = arith.constant 0 : index
      %22 = vector.load %arg9[%c0_14, %c0_15] : memref<8x64xf32, #tpu.memory_space<vmem>>, vector<8x64xf32>
      %cst_16 = arith.constant dense<0.000000e+00> : vector<8x64xf32>
      %23 = tpu.matmul %22, %14, %cst_16 {dimension_numbers = #tpu.dot_dimension_numbers<[1], [0], [0], [1], [0, 0, 1, 1], [], []>} : vector<8x64xf32>, vector<64x64xf32>, vector<8x64xf32> -> vector<8x64xf32>
      %24 = arith.addf %21, %23 : vector<8x64xf32>
      %25 = vector.broadcast %17 : vector<1x64xf32> to vector<8x64xf32>
      %26 = arith.addf %24, %25 : vector<8x64xf32>
      %27 = math.tanh %26 : vector<8x64xf32>
      %cst_17 = arith.constant dense<0.000000e+00> : vector<8x64xf32>
      %28 = tpu.matmul %27, %15, %cst_17 {dimension_numbers = #tpu.dot_dimension_numbers<[1], [0], [0], [1], [0, 0, 1, 1], [], []>} : vector<8x64xf32>, vector<64x64xf32>, vector<8x64xf32> -> vector<8x64xf32>
      %29 = vector.broadcast %18 : vector<1x64xf32> to vector<8x64xf32>
      %30 = arith.addf %28, %29 : vector<8x64xf32>
      %31 = math.tanh %30 : vector<8x64xf32>
      %cst_18 = arith.constant dense<0.000000e+00> : vector<8x128xf32>
      %32 = tpu.matmul %31, %16, %cst_18 {dimension_numbers = #tpu.dot_dimension_numbers<[1], [0], [0], [1], [0, 0, 1, 1], [], []>} : vector<8x64xf32>, vector<64x128xf32>, vector<8x128xf32> -> vector<8x128xf32>
      %33 = vector.broadcast %19 : vector<1x128xf32> to vector<8x128xf32>
      %34 = arith.addf %32, %33 : vector<8x128xf32>
      %c0_19 = arith.constant 0 : index
      %c0_20 = arith.constant 0 : index
      %35 = vector.load %arg8[%c0_19, %c0_20] : memref<8x128xf32, #tpu.memory_space<vmem>>, vector<8x128xf32>
      tpu.vector_store %arg8[%c0_19, %c0_20], %34 {strides = array<i32>} : memref<8x128xf32, #tpu.memory_space<vmem>>, vector<8x128xf32>,
    } else {
    }
    return
  }
  func.func @transform_0(%arg0: i32, %arg1: i32, %arg2: memref<2xi32, #tpu.memory_space<smem>>) -> (i32, i32) {
    %c1_i32 = arith.constant 1 : i32
    %0 = arith.muli %arg0, %c1_i32 : i32
    %1 = arith.addi %0, %arg1 : i32
    %2 = arith.index_cast %1 : i32 to index
    %3 = memref.load %arg2[%2] : memref<2xi32, #tpu.memory_space<smem>>
    %4 = arith.muli %3, %arg1 : i32
    %c0_i32 = arith.constant 0 : i32
    %c0_i32_0 = arith.constant 0 : i32
    return %4, %c0_i32 : i32, i32
  }
  func.func @transform_1(%arg0: i32, %arg1: i32, %arg2: memref<2xi32, #tpu.memory_space<smem>>) -> (i32, i32) {
    %c1_i32 = arith.constant 1 : i32
    %0 = arith.muli %arg0, %c1_i32 : i32
    %1 = arith.addi %0, %arg1 : i32
    %2 = arith.index_cast %1 : i32 to index
    %3 = memref.load %arg2[%2] : memref<2xi32, #tpu.memory_space<smem>>
    %4 = arith.muli %3, %arg1 : i32
    %c0_i32 = arith.constant 0 : i32
    %c0_i32_0 = arith.constant 0 : i32
    return %c0_i32, %4 : i32, i32
  }
  func.func @transform_2(%arg0: i32, %arg1: i32, %arg2: memref<2xi32, #tpu.memory_space<smem>>) -> (i32, i32) {
    %c0_i32 = arith.constant 0 : i32
    %c0_i32_0 = arith.constant 0 : i32
    return %arg0, %c0_i32 : i32, i32
  }
  func.func @transform_3(%arg0: i32, %arg1: i32, %arg2: memref<2xi32, #tpu.memory_space<smem>>) -> (i32, i32) {
    %c0_i32 = arith.constant 0 : i32
    %c0_i32_0 = arith.constant 0 : i32
    %c0_i32_1 = arith.constant 0 : i32
    return %c0_i32, %c0_i32_0 : i32, i32
  }
  func.func @transform_4(%arg0: i32, %arg1: i32, %arg2: memref<2xi32, #tpu.memory_space<smem>>) -> (i32, i32) {
    %c0_i32 = arith.constant 0 : i32
    %c0_i32_0 = arith.constant 0 : i32
    %c0_i32_1 = arith.constant 0 : i32
    return %c0_i32, %c0_i32_0 : i32, i32
  }
  func.func @transform_5(%arg0: i32, %arg1: i32, %arg2: memref<2xi32, #tpu.memory_space<smem>>) -> (i32, i32) {
    %c0_i32 = arith.constant 0 : i32
    %c0_i32_0 = arith.constant 0 : i32
    return %arg0, %c0_i32 : i32, i32
  }
}

</mosaic_0001>

<bundles_post_ra>
// kernel: tpu_custom_call.1
= control target key start
LH: loop header
LB: loop body
LE: loop exit
PB: predicated region body
PF: predicated region fallthrough
CT: control target
= control target key end

     0   :  { %s1559_s24 = smov [#allocation4]   ;;  %s1945_s0 = inlined_call_operand.vmem [shape: s32[2], index: 0, kind: input, shape index: {}]   ;;  %s1946_s1 = inlined_call_operand.vmem [shape: bf16[128,16], index: 1, kind: input, shape index: {}]   ;;  %s1947_s2 = inlined_call_operand.vmem [shape: s32[1,128], index: 2, kind: input, shape index: {}]   ;;  %s1948_s3 = inlined_call_operand.vmem [shape: f32[16,6], index: 3, kind: input, shape index: {}]   ;;  %s1949_s4 = inlined_call_operand.vmem [shape: bf16[256,64], index: 4, kind: input, shape index: {}]   ;;  %s1950_s5 = inlined_call_operand.vmem [shape: f32[224,128], index: 5, kind: input, shape index: {}]   ;;  %s1951_s6 = inlined_call_operand.hbm [shape: f32[16,128], index: 6, kind: output, shape index: {}]  }
   0x1   :  { %s12_s23 = sshll.u32 %s1945_s0, 4  ;;  %s13_s23 = int_to_ptr.vmem [resolvable:$true] %s12_s23 }
   0x2   :  { %15 = dma.vmem_to_smem %s13_s23, 16, %s1559_s24, [#allocation3] }
   0x3   :  { %1529 = dma.done.wait [#allocation3], 16 }
   0x4   :  { %1530 = vsyncadd [#allocation3], 4294967280 }
   0x5   :  { %18 = sfence }
   0x6   :  { %19 = vsyncpa [#allocation6], 0 }
   0x7   :  { %21 = vsyncpa [#allocation6 + $0x1], 0  ;;  %s1600_s25 = smov 0   ;;  %s1602_s26 = smov 0  }
   0x8   :  { %s1604_s27 = smov 0   ;;  %s1606_s28 = smov 0  }
   0x9   :  { %s1608_s29 = smov 0   ;;  %s1610_s30 = smov 0  }
   0xa LB: > { %s1144_s0 = sadd.s32 4294967295, %s1557_s30   ;;  %s1145_s7 = sadd.s32 4294967294, %s1557_s30   ;;  %s1557_s30 = sphi %s1610_s30, %s27_s30   ;;  %s1553_s29 = sphi %s1608_s29, %s1958_s29   ;;  %s1549_s28 = sphi %s1606_s28, %s1957_s28   ;;  %s1545_s27 = sphi %s1604_s27, %s1956_s27   ;;  %s1541_s26 = sphi %s1602_s26, %s1955_s26   ;;  %s1537_s25 = sphi %s1600_s25, %s1954_s25  }
   0xb   : > { %s39_s8 = sadd.s32 1, %s1553_s29  ;;  %s178_s9 = sadd.s32 1, %s1545_s27 }
   0xc   : > { %p41_p0 = scmp.ge.s32.totalorder %s39_s8, 2  ;;  %p188_p1 = scmp.ne.s32.totalorder %s1545_s27, %s1541_s26 }
   0xd   : > { %p189_p2 = scmp.eq.s32.totalorder %s1144_s0, 1  ;;  %p194_p3 = scmp.ne.s32.totalorder %s1541_s26, %s1537_s25 }
   0xe   : > { %s1960_s8 = smov (%p41_p0, %s39_s8), 0  ;;  %p195_p5 = scmp.eq.s32.totalorder %s1145_s7, 1 }
   0xf   : > { %p1640_p4 = por %p189_p2, %p188_p1  ;;  %s175_s11 = ssub.s32 %s1553_s29, %s1960_s8 }
  0x10   : > { %p1150_p6 = scmp.ge.s32.totalorder %s1557_s30, 1  ;;  %p176_p7 = scmp.eq.s32.totalorder %s175_s11, 0 }
  0x11   : > { %p1647_p8 = por %p195_p5, %p194_p3  ;;  %p253_p9 = scmp.lt.s32.totalorder %s1557_s30, 3 }
  0x12   : > { %s1653_s13 = scalar_select %p176_p7, %s1545_s27, %s178_s9  }
  0x13   : > { %p254_p10 = pnand %p1150_p6, %p253_p9 }
  0x14   : > { %s291_s14 = sand.u32 (!%p254_p10), 1, %s1541_s26   ;;  %p315_p11 = scmp.lt.s32.totalorder (!%p254_p10), %s1549_s28, 1 }
  0x15   : > { %257 = sbr.rel (%p254_p10) target bundleno = 1330 (0x532), region = 40  ;;  %s1659_s15 = sshll.u32 (!%p254_p10), %s291_s14, 3 }
  0x16   : > { %s327_s16 = sld [smem:[#allocation4 + %s1549_s28]] (!%p254_p10)  ;;  %s293_s22 = scalar_lea.vmem (!%p254_p10), [#allocation5], %s1659_s15 }
  0x1a   : > { %vm324_vm0 = vcmask 523264   ;;  %v1560_v0 = vmov 0.0   ;;  %s316_s17 = scalar_select %p315_p11, %s1549_s28, 1 }
  0x1b   : > { %325 = vst.msk [vmem:[#allocation2] sm:$0xff] %vm324_vm0, %v1560_v0 }
  0x1c   : > { %s1152_s18 = sshll.u32 %s316_s17, 3  ;;  %p1153_p12 = scmp.le.s32.totalorder %s327_s16, 0 }
  0x1d   : > { %s1667_s21 = scalar_lea.vmem %s1948_s3, %s1152_s18  ;;  %s1270_s9 = sshll.u32 (!%p1153_p12), %s1549_s28, 3 }
  0x1e   : > { %331 = sbr.rel (%p1153_p12) target bundleno = 899 (0x383), region = 48 }
  0x23   : > { %v1283_v1 = vld [vmem:[%s1949_s4] sm:$0xff]  ;;  %vm423_vm1 = vcmask 130048   ;;  %v1297_v3 = vld [vmem:[%s1946_s1 + $0x8] sm:$0xff]  ;;  %v1298_v4 = vld [vmem:[%s1946_s1 + $0x10] sm:$0xff] }
  0x24   : > { %v1296_v2 = vld [vmem:[%s1946_s1] sm:$0xff]  ;;  %455 = vmatpush.bf16.msra.mxu0 %v1283_v1  ;;  %v1299_v5 = vld [vmem:[%s1946_s1 + $0x18] sm:$0xff]  ;;  %v1301_v7 = vld [vmem:[%s1946_s1 + $0x28] sm:$0xff] }
  0x25   : > { %v1300_v6 = vld [vmem:[%s1946_s1 + $0x20] sm:$0xff]  ;;  %v1302_v8 = vld [vmem:[%s1946_s1 + $0x30] sm:$0xff]  ;;  %v1286_v10 = vld [vmem:[%s1949_s4 + $0x18] sm:$0xff] }
  0x26   : > { %v1287_v9 = vld [vmem:[%s1949_s4 + $0x20] sm:$0xff]  ;;  %v1285_v11 = vld [vmem:[%s1949_s4 + $0x10] sm:$0xff]  ;;  %v1284_v12 = vld [vmem:[%s1949_s4 + $0x8] sm:$0xff] }
  0x27   : > { %1190 = vmatmul.msk.bf16.vlgmr.msra.gmra.mxu0 %vm423_vm1, %v1296_v2  ;;  %576 = vmatpush.bf16.msra.mxu1 %v1287_v9  ;;  %v1303_v13 = vld [vmem:[%s1946_s1 + $0x38] sm:$0xff]  ;;  %v1291_v50 = vld [vmem:[%s1949_s4 + $0x40] sm:$0xff]  ;;  %v1289_v53 = vld [vmem:[%s1949_s4 + $0x30] sm:$0xff] }
  0x28   : > { %699 = vmatpush.bf16.msra.mxu2 %v1291_v50  ;;  %v1290_v51 = vld [vmem:[%s1949_s4 + $0x38] sm:$0xff]  ;;  %v1288_v55 = vld [vmem:[%s1949_s4 + $0x28] sm:$0xff]  ;;  %v1295_v50 = vld [vmem:[%s1949_s4 + $0x60] sm:$0xff] }
  0x29   : > { %v358_v58 = vld [vmem:[%s1949_s4 + $0x68] sm:$0x1]  ;;  %822 = vmatpush.bf16.msra.mxu3 %v1295_v50 }
  0x2a   : > { %v521_v59 = vunpack.c.l.bf16 %v358_v58 }
  0x2b   : > { %577 = vmatpush.bf16.msra.mxu1 %v1286_v10 }
  0x2c   : > { %700 = vmatpush.bf16.msra.mxu2 %v1290_v51  ;;  %v1740_v61 = vperm.slane %v521_v59, 0  ;;  %v1294_v51 = vld [vmem:[%s1949_s4 + $0x58] sm:$0xff] }
  0x2d   : > { %823 = vmatpush.bf16.msra.mxu3 %v1294_v51 }
  0x2f   : > { %578 = vmatpush.bf16.msra.mxu1 %v1285_v11 }
  0x30   : > { %701 = vmatpush.bf16.msra.mxu2 %v1289_v53 }
  0x33   : > { %579 = vmatpush.bf16.msra.mxu1 %v1284_v12 }
  0x34   : > { %702 = vmatpush.bf16.msra.mxu2 %v1288_v55  ;;  %v1293_v55 = vld [vmem:[%s1949_s4 + $0x50] sm:$0xff] }
  0x35   : > { %824 = vmatpush.bf16.msra.mxu3 %v1293_v55 }
  0x37   : > { %1191 = vmatmul.msk.bf16.gmra.mxu0 %vm423_vm1, %v1297_v3 }
  0x47   : > { %1192 = vmatmul.msk.bf16.gmra.mxu0 %vm423_vm1, %v1298_v4 }
  0x57   : > { %1193 = vmatmul.msk.bf16.gmra.mxu0 %vm423_vm1, %v1299_v5 }
  0x67   : > { %1194 = vmatmul.msk.bf16.gmra.mxu0 %vm423_vm1, %v1300_v6 }
  0x77   : > { %1195 = vmatmul.msk.bf16.gmra.mxu0 %vm423_vm1, %v1301_v7 }
  0x87   : > { %1196 = vmatmul.msk.bf16.gmra.mxu0 %vm423_vm1, %v1302_v8 }
  0x97   : > { %1197 = vmatmul.msk.bf16.gmra.mxu0 %vm423_vm1, %v1303_v13 }
  0xa4   : > { %v457_v14 = vpop.f32.mrf.mxu0 }
  0xa5   : > { %1362 = vtanh.f32 %v457_v14 }
  0xab   : > { %v1363_v16 = vpop.eup %1362 }
  0xac   : > { %v459_v15 = vpop.f32.mrf.mxu0 }
  0xad   : > { %1364 = vtanh.f32 %v459_v15 }
  0xb3   : > { %v1365_v17 = vpop.eup %1364 }
  0xb4   : > { %v462_v18 = vpop.f32.mrf.mxu0  ;;  %v513_v19 = vpack.c.bf16 %v1365_v17, %v1363_v16 }
  0xb5   : > { %1366 = vtanh.f32 %v462_v18 }
  0xb6   : > { %1214 = vmatmul.msk.bf16.vlgmr.msra.gmra.mxu1 %vm324_vm0, %v513_v19 }
  0xbb   : > { %v1367_v21 = vpop.eup %1366 }
  0xbc   : > { %v464_v20 = vpop.f32.mrf.mxu0 }
  0xbd   : > { %1368 = vtanh.f32 %v464_v20 }
  0xc3   : > { %v1369_v22 = vpop.eup %1368 }
  0xc4   : > { %v467_v23 = vpop.f32.mrf.mxu0  ;;  %v514_v24 = vpack.c.bf16 %v1369_v22, %v1367_v21 }
  0xc5   : > { %1370 = vtanh.f32 %v467_v23 }
  0xc6   : > { %1215 = vmatmul.msk.bf16.gmra.mxu1 %vm324_vm0, %v514_v24 }
  0xcb   : > { %v1371_v26 = vpop.eup %1370 }
  0xcc   : > { %v469_v25 = vpop.f32.mrf.mxu0 }
  0xcd   : > { %1372 = vtanh.f32 %v469_v25 }
  0xd3   : > { %v1373_v27 = vpop.eup %1372 }
  0xd4   : > { %v472_v28 = vpop.f32.mrf.mxu0  ;;  %v515_v29 = vpack.c.bf16 %v1373_v27, %v1371_v26 }
  0xd5   : > { %1374 = vtanh.f32 %v472_v28 }
  0xd6   : > { %1216 = vmatmul.msk.bf16.gmra.mxu1 %vm324_vm0, %v515_v29 }
  0xdb   : > { %v1375_v31 = vpop.eup %1374 }
  0xdc   : > { %v474_v30 = vpop.f32.mrf.mxu0 }
  0xdd   : > { %1376 = vtanh.f32 %v474_v30 }
  0xe3   : > { %v1377_v32 = vpop.eup %1376 }
  0xe4   : > { %v477_v33 = vpop.f32.mrf.mxu0  ;;  %v516_v34 = vpack.c.bf16 %v1377_v32, %v1375_v31 }
  0xe5   : > { %1378 = vtanh.f32 %v477_v33 }
  0xe6   : > { %1217 = vmatmul.msk.bf16.gmra.mxu1 %vm324_vm0, %v516_v34 }
  0xeb   : > { %v1379_v36 = vpop.eup %1378 }
  0xec   : > { %v479_v35 = vpop.f32.mrf.mxu0 }
  0xed   : > { %1380 = vtanh.f32 %v479_v35 }
  0xf3   : > { %v1381_v37 = vpop.eup %1380 }
  0xf4   : > { %v482_v38 = vpop.f32.mrf.mxu0  ;;  %v517_v39 = vpack.c.bf16 %v1381_v37, %v1379_v36 }
  0xf5   : > { %1382 = vtanh.f32 %v482_v38 }
  0xf6   : > { %1218 = vmatmul.msk.bf16.gmra.mxu1 %vm324_vm0, %v517_v39 }
  0xfb   : > { %v1383_v41 = vpop.eup %1382 }
  0xfc   : > { %v484_v40 = vpop.f32.mrf.mxu0 }
  0xfd   : > { %1384 = vtanh.f32 %v484_v40 }
 0x103   : > { %v1385_v42 = vpop.eup %1384 }
 0x104   : > { %v487_v43 = vpop.f32.mrf.mxu0  ;;  %v518_v44 = vpack.c.bf16 %v1385_v42, %v1383_v41 }
 0x105   : > { %1386 = vtanh.f32 %v487_v43 }
 0x106   : > { %1219 = vmatmul.msk.bf16.gmra.mxu1 %vm324_vm0, %v518_v44 }
 0x10b   : > { %v1387_v46 = vpop.eup %1386 }
 0x10c   : > { %v489_v45 = vpop.f32.mrf.mxu0 }
 0x10d   : > { %1388 = vtanh.f32 %v489_v45 }
 0x113   : > { %v1389_v47 = vpop.eup %1388 }
 0x114   : > { %v492_v48 = vpop.f32.mrf.mxu0  ;;  %v519_v49 = vpack.c.bf16 %v1389_v47, %v1387_v46 }
 0x115   : > { %1390 = vtanh.f32 %v492_v48 }
 0x116   : > { %1220 = vmatmul.msk.bf16.gmra.mxu1 %vm324_vm0, %v519_v49 }
 0x11b   : > { %v1391_v54 = vpop.eup %1390 }
 0x11c   : > { %v494_v52 = vpop.f32.mrf.mxu0 }
 0x11d   : > { %1392 = vtanh.f32 %v494_v52 }
 0x123   : > { %v1393_v56 = vpop.eup %1392 }
 0x124   : > { %v520_v57 = vpack.c.bf16 %v1393_v56, %v1391_v54  ;;  %v1292_v56 = vld [vmem:[%s1949_s4 + $0x48] sm:$0xff] }
 0x125   : > { %825 = vmatpush.bf16.msra.mxu3 %v1292_v56 }
 0x126   : > { %1221 = vmatmul.msk.bf16.gmra.mxu1 %vm324_vm0, %v520_v57  ;;  %v359_v57 = vld [vmem:[%s1949_s4 + $0x70] sm:$0x1] }
 0x127   : > { %v645_v58 = vunpack.c.l.bf16 %v359_v57 }
 0x133   : > { %v581_v60 = vpop.f32.mrf.mxu1 }
 0x134   : > { %v582_v62 = vadd.f32 %v581_v60, %v1740_v61  ;;  %v1781_v60 = vperm.slane %v645_v58, 0 }
 0x136   : > { %1394 = vtanh.f32 %v582_v62 }
 0x13b   : > { %v583_v63 = vpop.f32.mrf.mxu1 }
 0x13c   : > { %v584_v0 = vadd.f32 %v583_v63, %v1740_v61  ;;  %v1395_v1 = vpop.eup %1394 }
 0x13e   : > { %1396 = vtanh.f32 %v584_v0 }
 0x143   : > { %v586_v2 = vpop.f32.mrf.mxu1 }
 0x144   : > { %v1397_v3 = vpop.eup %1396  ;;  %v587_v5 = vadd.f32 %v586_v2, %v1740_v61 }
 0x145   : > { %v637_v4 = vpack.c.bf16 %v1397_v3, %v1395_v1 }
 0x146   : > { %1398 = vtanh.f32 %v587_v5 }
 0x147   : > { %1238 = vmatmul.msk.bf16.vlgmr.msra.gmra.mxu2 %vm324_vm0, %v637_v4 }
 0x14b   : > { %v588_v6 = vpop.f32.mrf.mxu1 }
 0x14c   : > { %v589_v7 = vadd.f32 %v588_v6, %v1740_v61  ;;  %v1399_v8 = vpop.eup %1398 }
 0x14e   : > { %1400 = vtanh.f32 %v589_v7 }
 0x153   : > { %v591_v9 = vpop.f32.mrf.mxu1 }
 0x154   : > { %v1401_v10 = vpop.eup %1400  ;;  %v592_v12 = vadd.f32 %v591_v9, %v1740_v61 }
 0x155   : > { %v638_v11 = vpack.c.bf16 %v1401_v10, %v1399_v8 }
 0x156   : > { %1402 = vtanh.f32 %v592_v12 }
 0x157   : > { %1239 = vmatmul.msk.bf16.gmra.mxu2 %vm324_vm0, %v638_v11 }
 0x15b   : > { %v593_v13 = vpop.f32.mrf.mxu1 }
 0x15c   : > { %v594_v14 = vadd.f32 %v593_v13, %v1740_v61  ;;  %v1403_v15 = vpop.eup %1402 }
 0x15e   : > { %1404 = vtanh.f32 %v594_v14 }
 0x163   : > { %v596_v16 = vpop.f32.mrf.mxu1 }
 0x164   : > { %v1405_v17 = vpop.eup %1404  ;;  %v597_v19 = vadd.f32 %v596_v16, %v1740_v61 }
 0x165   : > { %v639_v18 = vpack.c.bf16 %v1405_v17, %v1403_v15 }
 0x166   : > { %1406 = vtanh.f32 %v597_v19 }
 0x167   : > { %1240 = vmatmul.msk.bf16.gmra.mxu2 %vm324_vm0, %v639_v18 }
 0x16b   : > { %v598_v20 = vpop.f32.mrf.mxu1 }
 0x16c   : > { %v599_v21 = vadd.f32 %v598_v20, %v1740_v61  ;;  %v1407_v22 = vpop.eup %1406 }
 0x16e   : > { %1408 = vtanh.f32 %v599_v21 }
 0x173   : > { %v601_v23 = vpop.f32.mrf.mxu1 }
 0x174   : > { %v1409_v24 = vpop.eup %1408  ;;  %v602_v26 = vadd.f32 %v601_v23, %v1740_v61 }
 0x175   : > { %v640_v25 = vpack.c.bf16 %v1409_v24, %v1407_v22 }
 0x176   : > { %1410 = vtanh.f32 %v602_v26 }
 0x177   : > { %1241 = vmatmul.msk.bf16.gmra.mxu2 %vm324_vm0, %v640_v25 }
 0x17b   : > { %v603_v27 = vpop.f32.mrf.mxu1 }
 0x17c   : > { %v604_v28 = vadd.f32 %v603_v27, %v1740_v61  ;;  %v1411_v29 = vpop.eup %1410 }
 0x17e   : > { %1412 = vtanh.f32 %v604_v28 }
 0x183   : > { %v606_v30 = vpop.f32.mrf.mxu1 }
 0x184   : > { %v1413_v31 = vpop.eup %1412  ;;  %v607_v33 = vadd.f32 %v606_v30, %v1740_v61 }
 0x185   : > { %v641_v32 = vpack.c.bf16 %v1413_v31, %v1411_v29 }
 0x186   : > { %1414 = vtanh.f32 %v607_v33 }
 0x187   : > { %1242 = vmatmul.msk.bf16.gmra.mxu2 %vm324_vm0, %v641_v32 }
 0x18b   : > { %v608_v34 = vpop.f32.mrf.mxu1 }
 0x18c   : > { %v609_v35 = vadd.f32 %v608_v34, %v1740_v61  ;;  %v1415_v36 = vpop.eup %1414 }
 0x18e   : > { %1416 = vtanh.f32 %v609_v35 }
 0x193   : > { %v611_v37 = vpop.f32.mrf.mxu1 }
 0x194   : > { %v1417_v38 = vpop.eup %1416  ;;  %v612_v40 = vadd.f32 %v611_v37, %v1740_v61 }
 0x195   : > { %v642_v39 = vpack.c.bf16 %v1417_v38, %v1415_v36 }
 0x196   : > { %1418 = vtanh.f32 %v612_v40 }
 0x197   : > { %1243 = vmatmul.msk.bf16.gmra.mxu2 %vm324_vm0, %v642_v39 }
 0x19b   : > { %v613_v41 = vpop.f32.mrf.mxu1 }
 0x19c   : > { %v614_v42 = vadd.f32 %v613_v41, %v1740_v61  ;;  %v1419_v43 = vpop.eup %1418 }
 0x19e   : > { %1420 = vtanh.f32 %v614_v42 }
 0x1a3   : > { %v616_v44 = vpop.f32.mrf.mxu1 }
 0x1a4   : > { %v1421_v45 = vpop.eup %1420  ;;  %v617_v47 = vadd.f32 %v616_v44, %v1740_v61 }
 0x1a5   : > { %v643_v46 = vpack.c.bf16 %v1421_v45, %v1419_v43 }
 0x1a6   : > { %1422 = vtanh.f32 %v617_v47 }
 0x1a7   : > { %1244 = vmatmul.msk.bf16.gmra.mxu2 %vm324_vm0, %v643_v46 }
 0x1ab   : > { %v618_v48 = vpop.f32.mrf.mxu1 }
 0x1ac   : > { %v619_v49 = vadd.f32 %v618_v48, %v1740_v61  ;;  %v1423_v52 = vpop.eup %1422 }
 0x1ae   : > { %1424 = vtanh.f32 %v619_v49 }
 0x1b4   : > { %v1425_v53 = vpop.eup %1424 }
 0x1b5   : > { %v644_v54 = vpack.c.bf16 %v1425_v53, %v1423_v52  ;;  %v360_v52 = vld [vmem:[%s1949_s4 + $0x78] sm:$0x1] }
 0x1b7   : > { %1245 = vmatmul.msk.bf16.gmra.mxu2 %vm324_vm0, %v644_v54  ;;  %v768_v54 = vunpack.c.l.bf16 %v360_v52 }
 0x1b9   : > { %v769_v55 = vperm.slane %v768_v54, 0 }
 0x1ca   : > { %v704_v59 = vpop.f32.mrf.mxu2 }
 0x1cb   : > { %v705_v61 = vadd.f32 %v704_v59, %v1781_v60 }
 0x1cd   : > { %1426 = vtanh.f32 %v705_v61 }
 0x1d2   : > { %v706_v62 = vpop.f32.mrf.mxu2 }
 0x1d3   : > { %v707_v63 = vadd.f32 %v706_v62, %v1781_v60  ;;  %v1427_v0 = vpop.eup %1426 }
 0x1d5   : > { %1428 = vtanh.f32 %v707_v63 }
 0x1da   : > { %v709_v1 = vpop.f32.mrf.mxu2 }
 0x1db   : > { %v1429_v2 = vpop.eup %1428  ;;  %v710_v4 = vadd.f32 %v709_v1, %v1781_v60 }
 0x1dc   : > { %v760_v3 = vpack.c.bf16 %v1429_v2, %v1427_v0 }
 0x1dd   : > { %1430 = vtanh.f32 %v710_v4 }
 0x1de   : > { %1262 = vmatmul.msk.bf16.vlgmr.msra.gmra.mxu3 %vm324_vm0, %v760_v3 }
 0x1e2   : > { %v711_v5 = vpop.f32.mrf.mxu2 }
 0x1e3   : > { %v712_v6 = vadd.f32 %v711_v5, %v1781_v60  ;;  %v1431_v7 = vpop.eup %1430 }
 0x1e5   : > { %1432 = vtanh.f32 %v712_v6 }
 0x1ea   : > { %v714_v8 = vpop.f32.mrf.mxu2 }
 0x1eb   : > { %v1433_v9 = vpop.eup %1432  ;;  %v715_v11 = vadd.f32 %v714_v8, %v1781_v60 }
 0x1ec   : > { %v761_v10 = vpack.c.bf16 %v1433_v9, %v1431_v7 }
 0x1ed   : > { %1434 = vtanh.f32 %v715_v11 }
 0x1ee   : > { %1263 = vmatmul.msk.bf16.gmra.mxu3 %vm324_vm0, %v761_v10 }
 0x1f2   : > { %v716_v12 = vpop.f32.mrf.mxu2 }
 0x1f3   : > { %v717_v13 = vadd.f32 %v716_v12, %v1781_v60  ;;  %v1435_v14 = vpop.eup %1434 }
 0x1f5   : > { %1436 = vtanh.f32 %v717_v13 }
 0x1fa   : > { %v719_v15 = vpop.f32.mrf.mxu2 }
 0x1fb   : > { %v1437_v16 = vpop.eup %1436  ;;  %v720_v18 = vadd.f32 %v719_v15, %v1781_v60 }
 0x1fc   : > { %v762_v17 = vpack.c.bf16 %v1437_v16, %v1435_v14 }
 0x1fd   : > { %1438 = vtanh.f32 %v720_v18 }
 0x1fe   : > { %1264 = vmatmul.msk.bf16.gmra.mxu3 %vm324_vm0, %v762_v17 }
 0x202   : > { %v721_v19 = vpop.f32.mrf.mxu2 }
 0x203   : > { %v722_v20 = vadd.f32 %v721_v19, %v1781_v60  ;;  %v1439_v21 = vpop.eup %1438 }
 0x205   : > { %1440 = vtanh.f32 %v722_v20 }
 0x20a   : > { %v724_v22 = vpop.f32.mrf.mxu2 }
 0x20b   : > { %v1441_v23 = vpop.eup %1440  ;;  %v725_v25 = vadd.f32 %v724_v22, %v1781_v60 }
 0x20c   : > { %v763_v24 = vpack.c.bf16 %v1441_v23, %v1439_v21 }
 0x20d   : > { %1442 = vtanh.f32 %v725_v25 }
 0x20e   : > { %1265 = vmatmul.msk.bf16.gmra.mxu3 %vm324_vm0, %v763_v24 }
 0x212   : > { %v726_v26 = vpop.f32.mrf.mxu2 }
 0x213   : > { %v727_v27 = vadd.f32 %v726_v26, %v1781_v60  ;;  %v1443_v28 = vpop.eup %1442 }
 0x215   : > { %1444 = vtanh.f32 %v727_v27 }
 0x21a   : > { %v729_v29 = vpop.f32.mrf.mxu2 }
 0x21b   : > { %v1445_v30 = vpop.eup %1444  ;;  %v730_v32 = vadd.f32 %v729_v29, %v1781_v60 }
 0x21c   : > { %v764_v31 = vpack.c.bf16 %v1445_v30, %v1443_v28 }
 0x21d   : > { %1446 = vtanh.f32 %v730_v32  ;;  %v879_v32 = vstv %s1270_s9 }
 0x21e   : > { %1266 = vmatmul.msk.bf16.gmra.mxu3 %vm324_vm0, %v764_v31  ;;  %v877_v31 = vld [vmem:[%s1947_s2] sm:$0x1] }
 0x222   : > { %v731_v33 = vpop.f32.mrf.mxu2 }
 0x223   : > { %v732_v34 = vadd.f32 %v731_v33, %v1781_v60  ;;  %v1447_v35 = vpop.eup %1446  ;;  %v875_v33 = vlaneseq }
 0x225   : > { %1448 = vtanh.f32 %v732_v34  ;;  %v880_v34 = vsub.s32 %v877_v31, %v879_v32 }
 0x22a   : > { %v734_v36 = vpop.f32.mrf.mxu2 }
 0x22b   : > { %v1449_v37 = vpop.eup %1448  ;;  %v735_v39 = vadd.f32 %v734_v36, %v1781_v60  ;;  %v881_v36 = vperm.slane %v880_v34, 0 }
 0x22c   : > { %v765_v38 = vpack.c.bf16 %v1449_v37, %v1447_v35  ;;  %v876_v35 = vshrl.u32 %v875_v33, 7  ;;  %v1561_v37 = vmov 1.0|1.0  }
 0x22d   : > { %1450 = vtanh.f32 %v735_v39 }
 0x22e   : > { %1267 = vmatmul.msk.bf16.gmra.mxu3 %vm324_vm0, %v765_v38  ;;  %vm882_vm2 = vcmp.eq.s32.totalorder %v876_v35, %v881_v36  ;;  %v886_v38 = vld [vmem:[#allocation2] sm:$0xff] }
 0x22f   : > { %vm1272_vm3 = vmpackc.low %vm882_vm2, %vm882_vm2 }
 0x232   : > { %v736_v40 = vpop.f32.mrf.mxu2 }
 0x233   : > { %v737_v41 = vadd.f32 %v736_v40, %v1781_v60  ;;  %v1451_v42 = vpop.eup %1450 }
 0x235   : > { %1452 = vtanh.f32 %v737_v41 }
 0x23a   : > { %v739_v43 = vpop.f32.mrf.mxu2 }
 0x23b   : > { %v1453_v44 = vpop.eup %1452  ;;  %v740_v46 = vadd.f32 %v739_v43, %v1781_v60 }
 0x23c   : > { %v766_v45 = vpack.c.bf16 %v1453_v44, %v1451_v42 }
 0x23d   : > { %1454 = vtanh.f32 %v740_v46 }
 0x23e   : > { %1268 = vmatmul.msk.bf16.gmra.mxu3 %vm324_vm0, %v766_v45 }
 0x242   : > { %v741_v47 = vpop.f32.mrf.mxu2 }
 0x243   : > { %v742_v48 = vadd.f32 %v741_v47, %v1781_v60  ;;  %v1455_v49 = vpop.eup %1454 }
 0x245   : > { %1456 = vtanh.f32 %v742_v48 }
 0x24b   : > { %v1457_v50 = vpop.eup %1456 }
 0x24c   : > { %v767_v51 = vpack.c.bf16 %v1457_v50, %v1455_v49 }
 0x24e   : > { %1269 = vmatmul.msk.bf16.gmra.mxu3 %vm324_vm0, %v767_v51 }
 0x261   : > { %v827_v53 = vpop.f32.mrf.mxu3 }
 0x262   : > { %v828_v57 = vadd.f32 %v827_v53, %v769_v55 }
 0x269   : > { %v829_v56 = vpop.f32.mrf.mxu3 }
 0x26a   : > { %v830_v58 = vadd.f32 %v829_v56, %v769_v55 }
 0x26c   : > { %v867_v59 = vpack.c.bf16 %v830_v58, %v828_v57 }
 0x271   : > { %v832_v61 = vpop.f32.mrf.mxu3 }
 0x272   : > { %v833_v62 = vadd.f32 %v832_v61, %v769_v55 }
 0x279   : > { %v834_v60 = vpop.f32.mrf.mxu3 }
 0x27a   : > { %v835_v63 = vadd.f32 %v834_v60, %v769_v55 }
 0x27c   : > { %v868_v0 = vpack.c.bf16 %v835_v63, %v833_v62 }
 0x281   : > { %v837_v1 = vpop.f32.mrf.mxu3 }
 0x282   : > { %v838_v3 = vadd.f32 %v837_v1, %v769_v55 }
 0x289   : > { %v839_v2 = vpop.f32.mrf.mxu3 }
 0x28a   : > { %v840_v4 = vadd.f32 %v839_v2, %v769_v55 }
 0x28c   : > { %v869_v5 = vpack.c.bf16 %v840_v4, %v838_v3 }
 0x291   : > { %v842_v6 = vpop.f32.mrf.mxu3 }
 0x292   : > { %v843_v8 = vadd.f32 %v842_v6, %v769_v55 }
 0x299   : > { %v844_v7 = vpop.f32.mrf.mxu3 }
 0x29a   : > { %v845_v9 = vadd.f32 %v844_v7, %v769_v55 }
 0x29c   : > { %v870_v10 = vpack.c.bf16 %v845_v9, %v843_v8 }
 0x2a1   : > { %v847_v11 = vpop.f32.mrf.mxu3 }
 0x2a2   : > { %v848_v29 = vadd.f32 %v847_v11, %v769_v55 }
 0x2a9   : > { %v849_v12 = vpop.f32.mrf.mxu3 }
 0x2aa   : > { %v850_v27 = vadd.f32 %v849_v12, %v769_v55 }
 0x2ac   : > { %v871_v30 = vpack.c.bf16 %v850_v27, %v848_v29 }
 0x2b1   : > { %v852_v13 = vpop.f32.mrf.mxu3 }
 0x2b2   : > { %v853_v26 = vadd.f32 %v852_v13, %v769_v55 }
 0x2b9   : > { %v854_v14 = vpop.f32.mrf.mxu3 }
 0x2ba   : > { %v855_v24 = vadd.f32 %v854_v14, %v769_v55 }
 0x2bc   : > { %v872_v28 = vpack.c.bf16 %v855_v24, %v853_v26 }
 0x2c1   : > { %v857_v15 = vpop.f32.mrf.mxu3 }
 0x2c2   : > { %v858_v23 = vadd.f32 %v857_v15, %v769_v55 }
 0x2c9   : > { %v859_v16 = vpop.f32.mrf.mxu3 }
 0x2ca   : > { %v860_v21 = vadd.f32 %v859_v16, %v769_v55 }
 0x2cc   : > { %v873_v25 = vpack.c.bf16 %v860_v21, %v858_v23 }
 0x2d1   : > { %v862_v17 = vpop.f32.mrf.mxu3 }
 0x2d2   : > { %v863_v19 = vadd.f32 %v862_v17, %v769_v55 }
 0x2d9   : > { %v864_v18 = vpop.f32.mrf.mxu3 }
 0x2da   : > { %v865_v20 = vadd.f32 %v864_v18, %v769_v55 }
 0x2dc   : > { %v874_v22 = vpack.c.bf16 %v865_v20, %v863_v19 }
 0x2de   : > { %887 = vmatpush.bf16.msrb.mxu0 %v874_v22 }
 0x2e2   : > { %888 = vmatpush.bf16.msrb.mxu0 %v873_v25 }
 0x2e6   : > { %889 = vmatpush.bf16.msrb.mxu0 %v872_v28 }
 0x2ea   : > { %890 = vmatpush.bf16.msrb.mxu0 %v871_v30 }
 0x2ee   : > { %891 = vmatpush.bf16.msrb.mxu0 %v870_v10 }
 0x2f2   : > { %892 = vmatpush.bf16.msrb.mxu0 %v869_v5 }
 0x2f6   : > { %893 = vmatpush.bf16.msrb.mxu0 %v868_v0 }
 0x2fa   : > { %894 = vmatpush.bf16.msrb.mxu0 %v867_v59 }
 0x2fd   : > { %1273 = vmatmul.msk.bf16.vlgmr.msrb.gmra.mxu0 %vm1272_vm3, %v1561_v37 }
 0x37a   : > { %v896_v39 = vpop.f32.mrf.mxu0 }
 0x37b   : > { %v900_v40 = vadd.f32 %v896_v39, %v886_v38 }
 0x37d   : > { %901 = vst.msk [vmem:[#allocation2] sm:$0xff] %vm324_vm0, %v900_v40 }
 0x382   : > { %v898_v41 = vpop.f32.mrf.mxu0 }
 0x383 PF: > { %v913_v42 = vld [vmem:[%s1950_s5 + $0x40] sm:$0xff]  ;;  %v912_v43 = vld [vmem:[%s1950_s5 + $0x38] sm:$0xff]  ;;  %vm963_vm4 = vcmask 1045504   ;;  %vm959_vm5 = vcmask 48128   ;;  %v911_v44 = vld [vmem:[%s1950_s5 + $0x30] sm:$0xff]  ;;  %s1053_s18 = sshll.u32 %s293_s22, 4  ;;  %s1054_s18 = int_to_ptr.vmem [resolvable:$true] %s1053_s18 }
 0x384   : > { %947 = vmatpush.msra.mxu0 %v913_v42  ;;  %v905_v45 = vld [vmem:[%s1950_s5] sm:$0x3f]  ;;  %v910_v46 = vld [vmem:[%s1950_s5 + $0x28] sm:$0xff]  ;;  %v920_v49 = vld [vmem:[%s1950_s5 + $0x78] sm:$0xff]  ;;  %s1041_s20 = scalar_lea.sflag [#allocation6], %s291_s14 }
 0x385   : > { %1275 = vmatpush.msk.msra.mxu1 %vm963_vm4, %v905_v45  ;;  %v933_v47 = vld [vmem:[%s1667_s21] sm:$0xff]  ;;  %v908_v51 = vld [vmem:[%s1950_s5 + $0x18] sm:$0xff]  ;;  %v907_v52 = vld [vmem:[%s1950_s5 + $0x10] sm:$0xff]  ;;  %s1280_s21 = sshll.u32 %s1549_s28, 3 }
 0x386   : > { %948 = vmatpush.msra.mxu0 %v912_v43  ;;  %v921_v48 = vld [vmem:[%s1950_s5 + $0x80] sm:$0xff]  ;;  %1276 = vmatmul.msk.f32.vlgmr.msra.gmra.mxu1 %vm959_vm5, %v933_v47  ;;  %v906_v53 = vld [vmem:[%s1950_s5 + $0x8] sm:$0xff]  ;;  %v919_v55 = vld [vmem:[%s1950_s5 + $0x70] sm:$0xff]  ;;  %s1051_s11 = scalar_lea.hbm %s1951_s6, %s1280_s21  ;;  %s1497_s21 = scalar_lea.hbm %s1951_s6, 16 }
 0x387   : > { %1002 = vmatpush.msra.mxu2 %v921_v48  ;;  %v909_v50 = vld [vmem:[%s1950_s5 + $0x20] sm:$0xff]  ;;  %v918_v56 = vld [vmem:[%s1950_s5 + $0x68] sm:$0xff]  ;;  %v916_v58 = vld [vmem:[%s1950_s5 + $0x58] sm:$0xff]  ;;  %s1055_s19 = sshll.u32 %s1051_s11, 4  ;;  %s1056_s19 = int_to_ptr.hbm [resolvable:$true] %s1055_s19 }
 0x388   : > { %949 = vmatpush.msra.mxu0 %v911_v44  ;;  %v934_v54 = vld [vmem:[#allocation2] sm:$0xff]  ;;  %v915_v59 = vld [vmem:[%s1950_s5 + $0x50] sm:$0xff]  ;;  %v914_v61 = vld [vmem:[%s1950_s5 + $0x48] sm:$0xff]  ;;  %s1491_s28 = sshra.s32 %s1056_s19, 4  ;;  %s1492_s28 = int_to_ptr.hbm [resolvable:$true] %s1491_s28 }
 0x389   : > { %1003 = vmatpush.msra.mxu2 %v920_v49  ;;  %v917_v57 = vld [vmem:[%s1950_s5 + $0x60] sm:$0xff]  ;;  %v928_v62 = vld [vmem:[%s1950_s5 + $0xb8] sm:$0xff]  ;;  %v927_v63 = vld [vmem:[%s1950_s5 + $0xb0] sm:$0xff]  ;;  %s1493_s23 = scalar_lea.hbm %s1492_s28, 8  ;;  %p1498_p2 = scmp.lt.s32.totalorder %s1492_s28, %s1951_s6 }
 0x38a   : > { %950 = vmatpush.msra.mxu0 %v910_v46  ;;  %v929_v60 = vld [vmem:[%s1950_s5 + $0xc0] sm:$0xff]  ;;  %v1458_v1 = vld [vmem:[%s1950_s5 + $0xc8] ss:$0 sm:$0xff]  ;;  %v924_v8 = vld [vmem:[%s1950_s5 + $0x98] sm:$0xff]  ;;  %p1494_p13 = scmp.ne.s32.totalorder %s1492_s28, %s1493_s23  ;;  %p1499_p3 = scmp.lt.s32.totalorder %s1497_s21, %s1493_s23 }
 0x38b   : > { %1004 = vmatpush.msra.mxu2 %v919_v55  ;;  %1027 = vmatpush.msra.mxu3 %v929_v60  ;;  %v926_v6 = vld [vmem:[%s1950_s5 + $0xa8] sm:$0xff]  ;;  %v925_v7 = vld [vmem:[%s1950_s5 + $0xa0] sm:$0xff]  ;;  %v923_v9 = vld [vmem:[%s1950_s5 + $0x90] sm:$0xff] }
 0x38c   : > { %951 = vmatpush.msra.mxu0 %v909_v50  ;;  %v922_v10 = vld [vmem:[%s1950_s5 + $0x88] sm:$0xff]  ;;  %v1459_v11 = vld [vmem:[%s1950_s5 + $0xd0] ss:$0 sm:$0xff]  ;;  %v1460_v15 = vld [vmem:[%s1950_s5 + $0xd8] ss:$0 sm:$0xff]  ;;  %p1495_p0 = pnand %p1494_p13, %p1640_p4  ;;  %p1500_p5 = por %p1499_p3, %p1498_p2 }
 0x38d   : > { %1005 = vmatpush.msra.mxu2 %v918_v56  ;;  %1028 = vmatpush.msra.mxu3 %v928_v62 }
 0x38e   : > { %952 = vmatpush.msra.mxu0 %v908_v51  ;;  %p1496_p1 = pneg %p1495_p0 }
 0x38f   : > { %1006 = vmatpush.msra.mxu2 %v917_v57  ;;  %1029 = vmatpush.msra.mxu3 %v927_v63 }
 0x390   : > { %953 = vmatpush.msra.mxu0 %v907_v52  ;;  %p1501_p6 = pnand %p1500_p5, %p1496_p1 }
 0x391   : > { %1007 = vmatpush.msra.mxu2 %v916_v58  ;;  %1030 = vmatpush.msra.mxu3 %v926_v6 }
 0x392   : > { %954 = vmatpush.msra.mxu0 %v906_v53 }
 0x393   : > { %1274 = vmatmul.msk.f32.vlgmr.msra.gmra.mxu0 %vm324_vm0, %v934_v54  ;;  %1008 = vmatpush.msra.mxu2 %v915_v59 }
 0x394   : > { %1031 = vmatpush.msra.mxu3 %v925_v7 }
 0x395   : > { %1009 = vmatpush.msra.mxu2 %v914_v61 }
 0x396   : > { %1032 = vmatpush.msra.mxu3 %v924_v8 }
 0x398   : > { %1033 = vmatpush.msra.mxu3 %v923_v9 }
 0x39a   : > { %1034 = vmatpush.msra.mxu3 %v922_v10 }
 0x403   : > { %v984_v0 = vpop.f32.mrf.mxu1 }
 0x410   : > { %v956_v2 = vpop.f32.mrf.mxu0 }
 0x411   : > { %v985_v3 = vadd.f32 %v984_v0, %v956_v2 }
 0x413   : > { %v988_v4 = vadd.f32 %v1458_v1, %v985_v3 }
 0x415   : > { %1461 = vtanh.f32 %v988_v4 }
 0x41b   : > { %v1462_v5 = vpop.eup %1461 }
 0x41c   : > { %1277 = vmatmul.msk.f32.vlgmr.msra.gmra.mxu2 %vm324_vm0, %v1462_v5 }
 0x49f   : > { %v1011_v12 = vpop.f32.mrf.mxu2 }
 0x4a0   : > { %v1012_v13 = vadd.f32 %v1459_v11, %v1011_v12 }
 0x4a2   : > { %1463 = vtanh.f32 %v1012_v13 }
 0x4a8   : > { %v1464_v14 = vpop.eup %1463 }
 0x4a9   : > { %1278 = vmatmul.msk.f32.vlgmr.msra.gmra.mxu3 %vm324_vm0, %v1464_v14 }
 0x52c   : > { %v1036_v16 = vpop.f32.mrf.mxu3 }
 0x52d   : > { %v1037_v17 = vadd.f32 %v1460_v15, %v1036_v16 }
 0x52f   : > { %1039 = vst [vmem:[%s293_s22] sm:$0xff] %v1037_v17 }
 0x530   : > { %1504 = shalt.err (!%p1501_p6)
}
 0x531   : > { %1304 = dma.vmem_to_hbm [thread:$0]  (%p1640_p4), %s1054_s18, 128, %s1056_s19, %s1041_s20  }
 0x532 PF: > { %p1310_p7 = scmp.ge.s32.totalorder %s1557_s30, 2  ;;  %s1067_s14 = sand.u32 1, %s1537_s25  }
 0x533   : > { %s1068_s15 = scalar_lea.sflag [#allocation6], %s1067_s14 }
 0x534   : > { %p1307_p9 = pnand %p1310_p7, %p1647_p8 }
 0x536   : > { %p1308_p10 = pneg %p1307_p9 }
 0x538   : > { %1532 = dma.done.wait (%p1308_p10), %s1068_s15, 128  }
 0x539   : > { %1534 = vsyncadd (%p1308_p10), %s1068_s15, 4294967168  ;;  %s27_s30 = sadd.s32 1, %s1557_s30   ;;  %s1954_s25 = smov %s1541_s26 }
 0x53a   : > { %p24_p11 = scmp.ge.s32.totalorder %s27_s30, 4   ;;  %s1955_s26 = smov %s1545_s27 }
 0x53b   : > { %s1956_s27 = smov %s1653_s13  ;;  %s1957_s28 = smov %s1553_s29 }
 0x53c   : > { %s1958_s29 = smov %s1960_s8  ;;  %26 = sbr.rel (!%p24_p11) target bundleno = 10 (0xa), region = 93 }
 0x541   :  { %1074 = vsyncpa [#allocation6], 1 }
 0x542   :  { %1076 = vsyncpa [#allocation6 + $0x1], 1 }

</bundles_post_ra>
